<compile_context>
chip_gen: v5e
topology: v5e:2x2
jax: 0.10.0
libtpu: 0.0.40
codegen_flags: <defaults>
</compile_context>

<pallas_src>
import functools

import jax
import jax.numpy as jnp
from jax.experimental import pallas as pl
from jax.experimental.pallas import tpu as pltpu


def _gwsa_kernel(x_ref, mask_ref, wqkv_ref, bqkv_ref, wo_ref, bo_ref, out_ref,
                 attn_scr, *, num_heads, head_dim, seq_len, batch_block):
    HD = num_heads * head_dim

    # Fused (pre-scaled) Q|K|V projection: one wide MXU matmul, f32 accumulation.
    qkv = jnp.dot(x_ref[...], wqkv_ref[...],
                  preferred_element_type=jnp.float32) + bqkv_ref[...]
    # qkv: (Bt*N, 3*HD); columns [0:HD)=Q*sqrt(hidden), [HD:2HD)=K, [2HD:3HD)=V.

    # HD == 128 here, so these splits are full lane-tile slices (free).
    q_all = qkv[:, :HD]
    k_all = qkv[:, HD:2 * HD]
    v_all = qkv[:, 2 * HD:3 * HD]

    mask = mask_ref[...]                                        # (N, N), hoisted

    # Static unroll: at Bt<=2, N=8, H=8 every per-head tensor is a few vregs, so
    # live ranges stay tiny and the LLO scheduler sees the whole loop body.
    for bi in range(batch_block):
        r0 = bi * seq_len
        for h in range(num_heads):
            c0 = h * head_dim
            qh = q_all[r0:r0 + seq_len, c0:c0 + head_dim]        # (N, hd)
            kh = k_all[r0:r0 + seq_len, c0:c0 + head_dim]
            vh = v_all[r0:r0 + seq_len, c0:c0 + head_dim]

            # scores = (Q*scale) . K + mask ; contraction on the feature dim, so
            # no explicit K^T / vxpose.
            s = jnp.einsum('qd,kd->qk', qh, kh,
                           preferred_element_type=jnp.float32) + mask

            # Softmax in f32; normalize AFTER P@V on the small (N, hd) tensor.
            m = jnp.max(s, axis=-1, keepdims=True)
            p = jnp.exp(s - m)                                   # unnormalized
            denom = jnp.sum(p, axis=-1, keepdims=True)

            o = jnp.dot(p, vh, preferred_element_type=jnp.float32)   # (N, hd)
            o = o * pl.reciprocal(denom, approx=True)                # EUP slot

            # Scatter this head's output to its lane offset in the (M, HD) scratch.
            attn_scr[pl.ds(r0, seq_len), pl.ds(c0, head_dim)] = o

    # One K=128 MXU output projection instead of 8 K=16 matmuls + 7 VALU adds.
    out = jnp.dot(attn_scr[...], wo_ref[...],
                  preferred_element_type=jnp.float32) + bo_ref[...]
    out_ref[...] = out.astype(out_ref.dtype)


def graphwise_self_attention(x, mask, params, *, num_heads, hidden_size,
                             batch_block=None):
    """x: (B, N, D) f32; mask: (N, N) additive f32. Returns (B, N, hidden_size)."""
    B, N, D = x.shape
    HD = num_heads * hidden_size
    scale = float(hidden_size) ** 0.5

    if batch_block is None:
        # >= 2 grid steps so ("parallel",) can use both v7x TensorCores.
        batch_block = max(1, B // 2)
    assert B % batch_block == 0, "batch_block must divide the batch size"
    Bt = batch_block
    M = Bt * N

    wq, bq, wk, bk, wv, bv, wo, bo = params
    # Fuse the three projections; fold the sqrt(hidden) scale into the Q columns.
    wqkv = jnp.concatenate([wq * scale, wk, wv], axis=1)        # (D, 3*HD)
    bqkv = jnp.concatenate([bq * scale, bk, bv], axis=1)        # (1, 3*HD)

    # Flatten batch*seq in the wrapper (free metadata reshape on contiguous HBM).
    x2d = x.reshape(B * N, D)

    kernel = functools.partial(_gwsa_kernel, num_heads=num_heads,
                               head_dim=hidden_size, seq_len=N, batch_block=Bt)

    # Constant index maps => weights / mask stay VMEM-resident across grid steps.
    def const(shape):
        return pl.BlockSpec(shape, lambda b: (0,) * len(shape))

    flops = (2 * B * N * D * 3 * HD                                   # fused QKV
             + 2 * 2 * B * num_heads * N * N * hidden_size            # scores + P@V
             + 2 * B * N * HD * hidden_size)                          # out proj
    transcendentals = B * num_heads * N * (N + 1)                     # exp + recip
    bytes_accessed = 4 * (B * N * D + N * N + D * 3 * HD + 3 * HD
                          + HD * hidden_size + hidden_size + B * N * hidden_size)

    out2d = pl.pallas_call(
        kernel,
        out_shape=jax.ShapeDtypeStruct((B * N, hidden_size), jnp.float32),
        grid_spec=pltpu.PrefetchScalarGridSpec(
            num_scalar_prefetch=0,
            grid=(B // Bt,),
            in_specs=[
                pl.BlockSpec((M, D), lambda b: (b, 0)),               # x (flat rows)
                const((N, N)),                                        # additive mask
                const((D, 3 * HD)), const((1, 3 * HD)),               # Wqkv, bqkv
                const((HD, hidden_size)), const((1, hidden_size)),    # Wo, bo
            ],
            out_specs=pl.BlockSpec((M, hidden_size), lambda b: (b, 0)),
            scratch_shapes=[pltpu.VMEM((M, HD), jnp.float32)],
        ),
        compiler_params=pltpu.CompilerParams(
            dimension_semantics=("parallel",)),
        cost_estimate=pl.CostEstimate(flops=flops,
                                      transcendentals=transcendentals,
                                      bytes_accessed=bytes_accessed),
    )(x2d, mask, wqkv, bqkv, wo, bo)

    return out2d.reshape(B, N, hidden_size)


def _reference(x, mask, params, *, num_heads, hidden_size):
    wq, bq, wk, bk, wv, bv, wo, bo = params
    B, N, D = x.shape
    scale = float(hidden_size) ** 0.5
    q = (x @ wq + bq[0]).reshape(B, N, num_heads, hidden_size).transpose(0, 2, 1, 3)
    k = (x @ wk + bk[0]).reshape(B, N, num_heads, hidden_size).transpose(0, 2, 1, 3)
    v = (x @ wv + bv[0]).reshape(B, N, num_heads, hidden_size).transpose(0, 2, 1, 3)
    scores = jnp.einsum('bhqd,bhkd->bhqk', q, k) * scale + mask[None, None]
    p = jax.nn.softmax(scores, axis=-1)
    attn = jnp.einsum('bhqk,bhkd->bhqd', p, v)
    attn = attn.transpose(0, 2, 1, 3).reshape(B, N, num_heads * hidden_size)
    return attn @ wo + bo[0]


if __name__ == "__main__":
    # Shapes consistent with the module's forward:
    #   input_size D=32, hidden_size=16, num_heads=8 -> hidden*heads = 128.
    B, N, D = 2, 8, 32
    hidden_size, num_heads = 16, 8
    HD = hidden_size * num_heads

    key = jax.random.PRNGKey(0)
    ks = jax.random.split(key, 10)

    def linear_init(kw, kb, fan_in, fan_out):
        bound = 1.0 / (fan_in ** 0.5)
        w = jax.random.uniform(kw, (fan_in, fan_out), jnp.float32, -bound, bound)
        b = jax.random.uniform(kb, (1, fan_out), jnp.float32, -bound, bound)
        return w, b

    wq, bq = linear_init(ks[0], ks[1], D, HD)
    wk, bk = linear_init(ks[2], ks[3], D, HD)
    wv, bv = linear_init(ks[4], ks[5], D, HD)
    wo, bo = linear_init(ks[6], ks[7], HD, hidden_size)
    params = (wq, bq, wk, bk, wv, bv, wo, bo)

    x = jax.random.normal(ks[8], (B, N, D), jnp.float32)
    # additive float mask (PyTorch float-mask semantics for SDPA)
    mask = jax.random.normal(ks[9], (N, N), jnp.float32) * 0.1

    ref = _reference(x, mask, params, num_heads=num_heads, hidden_size=hidden_size)

    # Default path: batch_block = max(1, B // 2) = 1 (2 grid steps, v7x-friendly).
    out = jax.block_until_ready(
        graphwise_self_attention(x, mask, params,
                                 num_heads=num_heads, hidden_size=hidden_size))
    assert out.shape == (B, N, hidden_size)
    assert jnp.allclose(out, ref, atol=5e-3, rtol=5e-3), \
        f"default-path max abs err {jnp.max(jnp.abs(out - ref))}"

    # Whole-batch-in-one-step path (exercises the Bt > 1 in-kernel batch loop).
    out_fb = jax.block_until_ready(
        graphwise_self_attention(x, mask, params,
                                 num_heads=num_heads, hidden_size=hidden_size,
                                 batch_block=B))
    assert out_fb.shape == (B, N, hidden_size)
    assert jnp.allclose(out_fb, ref, atol=5e-3, rtol=5e-3), \
        f"full-batch-path max abs err {jnp.max(jnp.abs(out_fb - ref))}"

    print("KERNEL_OK")
</pallas_src>

<mosaic_0001>
module attributes {stable_mosaic.version = 11 : i64} {
  func.func @_gwsa_kernel(%arg0: i32, %arg1: memref<8x32xf32, #tpu.memory_space<vmem>>, %arg2: memref<8x8xf32, #tpu.memory_space<vmem>>, %arg3: memref<32x384xf32, #tpu.memory_space<vmem>>, %arg4: memref<1x384xf32, #tpu.memory_space<vmem>>, %arg5: memref<128x16xf32, #tpu.memory_space<vmem>>, %arg6: memref<1x16xf32, #tpu.memory_space<vmem>>, %arg7: memref<8x16xf32, #tpu.memory_space<vmem>>, %arg8: memref<8x128xf32, #tpu.memory_space<vmem>>) attributes {dimension_semantics = [#tpu.dimension_semantics<parallel>], iteration_bounds = array<i64: 2>, scalar_prefetch = 0 : i64, scratch_operands = 1 : i64, tpu.core_type = #tpu.core_type<tc>, window_params = [{transform_indices = @transform_0, window_bounds = array<i64: 8, 32>}, {pipeline_mode = #tpu.pipeline_mode<synchronous>, transform_indices = @transform_1, window_bounds = array<i64: 8, 8>}, {pipeline_mode = #tpu.pipeline_mode<synchronous>, transform_indices = @transform_2, window_bounds = array<i64: 32, 384>}, {pipeline_mode = #tpu.pipeline_mode<synchronous>, transform_indices = @transform_3, window_bounds = array<i64: 1, 384>}, {pipeline_mode = #tpu.pipeline_mode<synchronous>, transform_indices = @transform_4, window_bounds = array<i64: 128, 16>}, {pipeline_mode = #tpu.pipeline_mode<synchronous>, transform_indices = @transform_5, window_bounds = array<i64: 1, 16>}, {transform_indices = @transform_6, window_bounds = array<i64: 8, 16>}]} {
    %c0 = arith.constant 0 : index
    %c0_0 = arith.constant 0 : index
    %0 = vector.load %arg1[%c0, %c0_0] : memref<8x32xf32, #tpu.memory_space<vmem>>, vector<8x32xf32>
    %c0_1 = arith.constant 0 : index
    %c0_2 = arith.constant 0 : index
    %1 = vector.load %arg3[%c0_1, %c0_2] : memref<32x384xf32, #tpu.memory_space<vmem>>, vector<32x384xf32>
    %cst = arith.constant dense<0.000000e+00> : vector<8x384xf32>
    %2 = tpu.matmul %0, %1, %cst {dimension_numbers = #tpu.dot_dimension_numbers<[1], [0], [0], [1], [0, 0, 1, 1], [], []>} : vector<8x32xf32>, vector<32x384xf32>, vector<8x384xf32> -> vector<8x384xf32>
    %c0_3 = arith.constant 0 : index
    %c0_4 = arith.constant 0 : index
    %3 = vector.load %arg4[%c0_3, %c0_4] : memref<1x384xf32, #tpu.memory_space<vmem>>, vector<1x384xf32>
    %4 = vector.broadcast %3 : vector<1x384xf32> to vector<8x384xf32>
    %5 = arith.addf %2, %4 : vector<8x384xf32>
    %6 = vector.extract_strided_slice %5 {offsets = [0, 0], sizes = [8, 128], strides = [1, 1]} : vector<8x384xf32> to vector<8x128xf32>
    %7 = vector.extract_strided_slice %5 {offsets = [0, 128], sizes = [8, 128], strides = [1, 1]} : vector<8x384xf32> to vector<8x128xf32>
    %8 = vector.extract_strided_slice %5 {offsets = [0, 256], sizes = [8, 128], strides = [1, 1]} : vector<8x384xf32> to vector<8x128xf32>
    %c0_5 = arith.constant 0 : index
    %c0_6 = arith.constant 0 : index
    %9 = vector.load %arg2[%c0_5, %c0_6] : memref<8x8xf32, #tpu.memory_space<vmem>>, vector<8x8xf32>
    %10 = vector.extract_strided_slice %6 {offsets = [0, 0], sizes = [8, 16], strides = [1, 1]} : vector<8x128xf32> to vector<8x16xf32>
    %11 = vector.extract_strided_slice %7 {offsets = [0, 0], sizes = [8, 16], strides = [1, 1]} : vector<8x128xf32> to vector<8x16xf32>
    %12 = vector.extract_strided_slice %8 {offsets = [0, 0], sizes = [8, 16], strides = [1, 1]} : vector<8x128xf32> to vector<8x16xf32>
    "tpu.trace_start"() <{level = 10 : i32, message = "qd,kd->qk"}> : () -> ()
    %cst_7 = arith.constant dense<0.000000e+00> : vector<8x8xf32>
    %13 = tpu.matmul %10, %11, %cst_7 {dimension_numbers = #tpu.dot_dimension_numbers<[1], [1], [0], [0], [0, 0, 1, 0], [], []>} : vector<8x16xf32>, vector<8x16xf32>, vector<8x8xf32> -> vector<8x8xf32>
    "tpu.trace_stop"() : () -> ()
    %14 = arith.addf %13, %9 : vector<8x8xf32>
    %cst_8 = arith.constant dense<0xFF800000> : vector<8xf32>
    %15 = vector.multi_reduction <maximumf>, %14, %cst_8 [1] : vector<8x8xf32> to vector<8xf32>
    %16 = vector.shape_cast %15 : vector<8xf32> to vector<8x1xf32>
    %17 = vector.broadcast %16 : vector<8x1xf32> to vector<8x8xf32>
    %18 = arith.subf %14, %17 : vector<8x8xf32>
    %19 = math.exp %18 : vector<8x8xf32>
    %cst_9 = arith.constant dense<0.000000e+00> : vector<8xf32>
    %20 = vector.multi_reduction <add>, %19, %cst_9 [1] : vector<8x8xf32> to vector<8xf32>
    %21 = vector.shape_cast %20 : vector<8xf32> to vector<8x1xf32>
    %cst_10 = arith.constant dense<0.000000e+00> : vector<8x16xf32>
    %22 = tpu.matmul %19, %12, %cst_10 {dimension_numbers = #tpu.dot_dimension_numbers<[1], [0], [0], [1], [0, 0, 1, 1], [], []>} : vector<8x8xf32>, vector<8x16xf32>, vector<8x16xf32> -> vector<8x16xf32>
    %23 = tpu.reciprocal %21 {approx = true} : vector<8x1xf32> -> vector<8x1xf32>
    %24 = vector.broadcast %23 : vector<8x1xf32> to vector<8x16xf32>
    %25 = arith.mulf %22, %24 : vector<8x16xf32>
    %c0_11 = arith.constant 0 : index
    %c0_12 = arith.constant 0 : index
    %26 = vector.load %arg8[%c0_11, %c0_12] : memref<8x128xf32, #tpu.memory_space<vmem>>, vector<8x16xf32>
    tpu.vector_store %arg8[%c0_11, %c0_12], %25 {strides = array<i32>} : memref<8x128xf32, #tpu.memory_space<vmem>>, vector<8x16xf32>,
    %27 = vector.extract_strided_slice %6 {offsets = [0, 16], sizes = [8, 16], strides = [1, 1]} : vector<8x128xf32> to vector<8x16xf32>
    %28 = vector.extract_strided_slice %7 {offsets = [0, 16], sizes = [8, 16], strides = [1, 1]} : vector<8x128xf32> to vector<8x16xf32>
    %29 = vector.extract_strided_slice %8 {offsets = [0, 16], sizes = [8, 16], strides = [1, 1]} : vector<8x128xf32> to vector<8x16xf32>
    "tpu.trace_start"() <{level = 10 : i32, message = "qd,kd->qk"}> : () -> ()
    %cst_13 = arith.constant dense<0.000000e+00> : vector<8x8xf32>
    %30 = tpu.matmul %27, %28, %cst_13 {dimension_numbers = #tpu.dot_dimension_numbers<[1], [1], [0], [0], [0, 0, 1, 0], [], []>} : vector<8x16xf32>, vector<8x16xf32>, vector<8x8xf32> -> vector<8x8xf32>
    "tpu.trace_stop"() : () -> ()
    %31 = arith.addf %30, %9 : vector<8x8xf32>
    %cst_14 = arith.constant dense<0xFF800000> : vector<8xf32>
    %32 = vector.multi_reduction <maximumf>, %31, %cst_14 [1] : vector<8x8xf32> to vector<8xf32>
    %33 = vector.shape_cast %32 : vector<8xf32> to vector<8x1xf32>
    %34 = vector.broadcast %33 : vector<8x1xf32> to vector<8x8xf32>
    %35 = arith.subf %31, %34 : vector<8x8xf32>
    %36 = math.exp %35 : vector<8x8xf32>
    %cst_15 = arith.constant dense<0.000000e+00> : vector<8xf32>
    %37 = vector.multi_reduction <add>, %36, %cst_15 [1] : vector<8x8xf32> to vector<8xf32>
    %38 = vector.shape_cast %37 : vector<8xf32> to vector<8x1xf32>
    %cst_16 = arith.constant dense<0.000000e+00> : vector<8x16xf32>
    %39 = tpu.matmul %36, %29, %cst_16 {dimension_numbers = #tpu.dot_dimension_numbers<[1], [0], [0], [1], [0, 0, 1, 1], [], []>} : vector<8x8xf32>, vector<8x16xf32>, vector<8x16xf32> -> vector<8x16xf32>
    %40 = tpu.reciprocal %38 {approx = true} : vector<8x1xf32> -> vector<8x1xf32>
    %41 = vector.broadcast %40 : vector<8x1xf32> to vector<8x16xf32>
    %42 = arith.mulf %39, %41 : vector<8x16xf32>
    %c0_17 = arith.constant 0 : index
    %c16 = arith.constant 16 : index
    %43 = vector.load %arg8[%c0_17, %c16] : memref<8x128xf32, #tpu.memory_space<vmem>>, vector<8x16xf32>
    tpu.vector_store %arg8[%c0_17, %c16], %42 {strides = array<i32>} : memref<8x128xf32, #tpu.memory_space<vmem>>, vector<8x16xf32>,
    %44 = vector.extract_strided_slice %6 {offsets = [0, 32], sizes = [8, 16], strides = [1, 1]} : vector<8x128xf32> to vector<8x16xf32>
    %45 = vector.extract_strided_slice %7 {offsets = [0, 32], sizes = [8, 16], strides = [1, 1]} : vector<8x128xf32> to vector<8x16xf32>
    %46 = vector.extract_strided_slice %8 {offsets = [0, 32], sizes = [8, 16], strides = [1, 1]} : vector<8x128xf32> to vector<8x16xf32>
    "tpu.trace_start"() <{level = 10 : i32, message = "qd,kd->qk"}> : () -> ()
    %cst_18 = arith.constant dense<0.000000e+00> : vector<8x8xf32>
    %47 = tpu.matmul %44, %45, %cst_18 {dimension_numbers = #tpu.dot_dimension_numbers<[1], [1], [0], [0], [0, 0, 1, 0], [], []>} : vector<8x16xf32>, vector<8x16xf32>, vector<8x8xf32> -> vector<8x8xf32>
    "tpu.trace_stop"() : () -> ()
    %48 = arith.addf %47, %9 : vector<8x8xf32>
    %cst_19 = arith.constant dense<0xFF800000> : vector<8xf32>
    %49 = vector.multi_reduction <maximumf>, %48, %cst_19 [1] : vector<8x8xf32> to vector<8xf32>
    %50 = vector.shape_cast %49 : vector<8xf32> to vector<8x1xf32>
    %51 = vector.broadcast %50 : vector<8x1xf32> to vector<8x8xf32>
    %52 = arith.subf %48, %51 : vector<8x8xf32>
    %53 = math.exp %52 : vector<8x8xf32>
    %cst_20 = arith.constant dense<0.000000e+00> : vector<8xf32>
    %54 = vector.multi_reduction <add>, %53, %cst_20 [1] : vector<8x8xf32> to vector<8xf32>
    %55 = vector.shape_cast %54 : vector<8xf32> to vector<8x1xf32>
    %cst_21 = arith.constant dense<0.000000e+00> : vector<8x16xf32>
    %56 = tpu.matmul %53, %46, %cst_21 {dimension_numbers = #tpu.dot_dimension_numbers<[1], [0], [0], [1], [0, 0, 1, 1], [], []>} : vector<8x8xf32>, vector<8x16xf32>, vector<8x16xf32> -> vector<8x16xf32>
    %57 = tpu.reciprocal %55 {approx = true} : vector<8x1xf32> -> vector<8x1xf32>
    %58 = vector.broadcast %57 : vector<8x1xf32> to vector<8x16xf32>
    %59 = arith.mulf %56, %58 : vector<8x16xf32>
    %c0_22 = arith.constant 0 : index
    %c32 = arith.constant 32 : index
    %60 = vector.load %arg8[%c0_22, %c32] : memref<8x128xf32, #tpu.memory_space<vmem>>, vector<8x16xf32>
    tpu.vector_store %arg8[%c0_22, %c32], %59 {strides = array<i32>} : memref<8x128xf32, #tpu.memory_space<vmem>>, vector<8x16xf32>,
    %61 = vector.extract_strided_slice %6 {offsets = [0, 48], sizes = [8, 16], strides = [1, 1]} : vector<8x128xf32> to vector<8x16xf32>
    %62 = vector.extract_strided_slice %7 {offsets = [0, 48], sizes = [8, 16], strides = [1, 1]} : vector<8x128xf32> to vector<8x16xf32>
    %63 = vector.extract_strided_slice %8 {offsets = [0, 48], sizes = [8, 16], strides = [1, 1]} : vector<8x128xf32> to vector<8x16xf32>
    "tpu.trace_start"() <{level = 10 : i32, message = "qd,kd->qk"}> : () -> ()
    %cst_23 = arith.constant dense<0.000000e+00> : vector<8x8xf32>
    %64 = tpu.matmul %61, %62, %cst_23 {dimension_numbers = #tpu.dot_dimension_numbers<[1], [1], [0], [0], [0, 0, 1, 0], [], []>} : vector<8x16xf32>, vector<8x16xf32>, vector<8x8xf32> -> vector<8x8xf32>
    "tpu.trace_stop"() : () -> ()
    %65 = arith.addf %64, %9 : vector<8x8xf32>
    %cst_24 = arith.constant dense<0xFF800000> : vector<8xf32>
    %66 = vector.multi_reduction <maximumf>, %65, %cst_24 [1] : vector<8x8xf32> to vector<8xf32>
    %67 = vector.shape_cast %66 : vector<8xf32> to vector<8x1xf32>
    %68 = vector.broadcast %67 : vector<8x1xf32> to vector<8x8xf32>
    %69 = arith.subf %65, %68 : vector<8x8xf32>
    %70 = math.exp %69 : vector<8x8xf32>
    %cst_25 = arith.constant dense<0.000000e+00> : vector<8xf32>
    %71 = vector.multi_reduction <add>, %70, %cst_25 [1] : vector<8x8xf32> to vector<8xf32>
    %72 = vector.shape_cast %71 : vector<8xf32> to vector<8x1xf32>
    %cst_26 = arith.constant dense<0.000000e+00> : vector<8x16xf32>
    %73 = tpu.matmul %70, %63, %cst_26 {dimension_numbers = #tpu.dot_dimension_numbers<[1], [0], [0], [1], [0, 0, 1, 1], [], []>} : vector<8x8xf32>, vector<8x16xf32>, vector<8x16xf32> -> vector<8x16xf32>
    %74 = tpu.reciprocal %72 {approx = true} : vector<8x1xf32> -> vector<8x1xf32>
    %75 = vector.broadcast %74 : vector<8x1xf32> to vector<8x16xf32>
    %76 = arith.mulf %73, %75 : vector<8x16xf32>
    %c0_27 = arith.constant 0 : index
    %c48 = arith.constant 48 : index
    %77 = vector.load %arg8[%c0_27, %c48] : memref<8x128xf32, #tpu.memory_space<vmem>>, vector<8x16xf32>
    tpu.vector_store %arg8[%c0_27, %c48], %76 {strides = array<i32>} : memref<8x128xf32, #tpu.memory_space<vmem>>, vector<8x16xf32>,
    %78 = vector.extract_strided_slice %6 {offsets = [0, 64], sizes = [8, 16], strides = [1, 1]} : vector<8x128xf32> to vector<8x16xf32>
    %79 = vector.extract_strided_slice %7 {offsets = [0, 64], sizes = [8, 16], strides = [1, 1]} : vector<8x128xf32> to vector<8x16xf32>
    %80 = vector.extract_strided_slice %8 {offsets = [0, 64], sizes = [8, 16], strides = [1, 1]} : vector<8x128xf32> to vector<8x16xf32>
    "tpu.trace_start"() <{level = 10 : i32, message = "qd,kd->qk"}> : () -> ()
    %cst_28 = arith.constant dense<0.000000e+00> : vector<8x8xf32>
    %81 = tpu.matmul %78, %79, %cst_28 {dimension_numbers = #tpu.dot_dimension_numbers<[1], [1], [0], [0], [0, 0, 1, 0], [], []>} : vector<8x16xf32>, vector<8x16xf32>, vector<8x8xf32> -> vector<8x8xf32>
    "tpu.trace_stop"() : () -> ()
    %82 = arith.addf %81, %9 : vector<8x8xf32>
    %cst_29 = arith.constant dense<0xFF800000> : vector<8xf32>
    %83 = vector.multi_reduction <maximumf>, %82, %cst_29 [1] : vector<8x8xf32> to vector<8xf32>
    %84 = vector.shape_cast %83 : vector<8xf32> to vector<8x1xf32>
    %85 = vector.broadcast %84 : vector<8x1xf32> to vector<8x8xf32>
    %86 = arith.subf %82, %85 : vector<8x8xf32>
    %87 = math.exp %86 : vector<8x8xf32>
    %cst_30 = arith.constant dense<0.000000e+00> : vector<8xf32>
    %88 = vector.multi_reduction <add>, %87, %cst_30 [1] : vector<8x8xf32> to vector<8xf32>
    %89 = vector.shape_cast %88 : vector<8xf32> to vector<8x1xf32>
    %cst_31 = arith.constant dense<0.000000e+00> : vector<8x16xf32>
    %90 = tpu.matmul %87, %80, %cst_31 {dimension_numbers = #tpu.dot_dimension_numbers<[1], [0], [0], [1], [0, 0, 1, 1], [], []>} : vector<8x8xf32>, vector<8x16xf32>, vector<8x16xf32> -> vector<8x16xf32>
    %91 = tpu.reciprocal %89 {approx = true} : vector<8x1xf32> -> vector<8x1xf32>
    %92 = vector.broadcast %91 : vector<8x1xf32> to vector<8x16xf32>
    %93 = arith.mulf %90, %92 : vector<8x16xf32>
    %c0_32 = arith.constant 0 : index
    %c64 = arith.constant 64 : index
    %94 = vector.load %arg8[%c0_32, %c64] : memref<8x128xf32, #tpu.memory_space<vmem>>, vector<8x16xf32>
    tpu.vector_store %arg8[%c0_32, %c64], %93 {strides = array<i32>} : memref<8x128xf32, #tpu.memory_space<vmem>>, vector<8x16xf32>,
    %95 = vector.extract_strided_slice %6 {offsets = [0, 80], sizes = [8, 16], strides = [1, 1]} : vector<8x128xf32> to vector<8x16xf32>
    %96 = vector.extract_strided_slice %7 {offsets = [0, 80], sizes = [8, 16], strides = [1, 1]} : vector<8x128xf32> to vector<8x16xf32>
    %97 = vector.extract_strided_slice %8 {offsets = [0, 80], sizes = [8, 16], strides = [1, 1]} : vector<8x128xf32> to vector<8x16xf32>
    "tpu.trace_start"() <{level = 10 : i32, message = "qd,kd->qk"}> : () -> ()
    %cst_33 = arith.constant dense<0.000000e+00> : vector<8x8xf32>
    %98 = tpu.matmul %95, %96, %cst_33 {dimension_numbers = #tpu.dot_dimension_numbers<[1], [1], [0], [0], [0, 0, 1, 0], [], []>} : vector<8x16xf32>, vector<8x16xf32>, vector<8x8xf32> -> vector<8x8xf32>
    "tpu.trace_stop"() : () -> ()
    %99 = arith.addf %98, %9 : vector<8x8xf32>
    %cst_34 = arith.constant dense<0xFF800000> : vector<8xf32>
    %100 = vector.multi_reduction <maximumf>, %99, %cst_34 [1] : vector<8x8xf32> to vector<8xf32>
    %101 = vector.shape_cast %100 : vector<8xf32> to vector<8x1xf32>
    %102 = vector.broadcast %101 : vector<8x1xf32> to vector<8x8xf32>
    %103 = arith.subf %99, %102 : vector<8x8xf32>
    %104 = math.exp %103 : vector<8x8xf32>
    %cst_35 = arith.constant dense<0.000000e+00> : vector<8xf32>
    %105 = vector.multi_reduction <add>, %104, %cst_35 [1] : vector<8x8xf32> to vector<8xf32>
    %106 = vector.shape_cast %105 : vector<8xf32> to vector<8x1xf32>
    %cst_36 = arith.constant dense<0.000000e+00> : vector<8x16xf32>
    %107 = tpu.matmul %104, %97, %cst_36 {dimension_numbers = #tpu.dot_dimension_numbers<[1], [0], [0], [1], [0, 0, 1, 1], [], []>} : vector<8x8xf32>, vector<8x16xf32>, vector<8x16xf32> -> vector<8x16xf32>
    %108 = tpu.reciprocal %106 {approx = true} : vector<8x1xf32> -> vector<8x1xf32>
    %109 = vector.broadcast %108 : vector<8x1xf32> to vector<8x16xf32>
    %110 = arith.mulf %107, %109 : vector<8x16xf32>
    %c0_37 = arith.constant 0 : index
    %c80 = arith.constant 80 : index
    %111 = vector.load %arg8[%c0_37, %c80] : memref<8x128xf32, #tpu.memory_space<vmem>>, vector<8x16xf32>
    tpu.vector_store %arg8[%c0_37, %c80], %110 {strides = array<i32>} : memref<8x128xf32, #tpu.memory_space<vmem>>, vector<8x16xf32>,
    %112 = vector.extract_strided_slice %6 {offsets = [0, 96], sizes = [8, 16], strides = [1, 1]} : vector<8x128xf32> to vector<8x16xf32>
    %113 = vector.extract_strided_slice %7 {offsets = [0, 96], sizes = [8, 16], strides = [1, 1]} : vector<8x128xf32> to vector<8x16xf32>
    %114 = vector.extract_strided_slice %8 {offsets = [0, 96], sizes = [8, 16], strides = [1, 1]} : vector<8x128xf32> to vector<8x16xf32>
    "tpu.trace_start"() <{level = 10 : i32, message = "qd,kd->qk"}> : () -> ()
    %cst_38 = arith.constant dense<0.000000e+00> : vector<8x8xf32>
    %115 = tpu.matmul %112, %113, %cst_38 {dimension_numbers = #tpu.dot_dimension_numbers<[1], [1], [0], [0], [0, 0, 1, 0], [], []>} : vector<8x16xf32>, vector<8x16xf32>, vector<8x8xf32> -> vector<8x8xf32>
    "tpu.trace_stop"() : () -> ()
    %116 = arith.addf %115, %9 : vector<8x8xf32>
    %cst_39 = arith.constant dense<0xFF800000> : vector<8xf32>
    %117 = vector.multi_reduction <maximumf>, %116, %cst_39 [1] : vector<8x8xf32> to vector<8xf32>
    %118 = vector.shape_cast %117 : vector<8xf32> to vector<8x1xf32>
    %119 = vector.broadcast %118 : vector<8x1xf32> to vector<8x8xf32>
    %120 = arith.subf %116, %119 : vector<8x8xf32>
    %121 = math.exp %120 : vector<8x8xf32>
    %cst_40 = arith.constant dense<0.000000e+00> : vector<8xf32>
    %122 = vector.multi_reduction <add>, %121, %cst_40 [1] : vector<8x8xf32> to vector<8xf32>
    %123 = vector.shape_cast %122 : vector<8xf32> to vector<8x1xf32>
    %cst_41 = arith.constant dense<0.000000e+00> : vector<8x16xf32>
    %124 = tpu.matmul %121, %114, %cst_41 {dimension_numbers = #tpu.dot_dimension_numbers<[1], [0], [0], [1], [0, 0, 1, 1], [], []>} : vector<8x8xf32>, vector<8x16xf32>, vector<8x16xf32> -> vector<8x16xf32>
    %125 = tpu.reciprocal %123 {approx = true} : vector<8x1xf32> -> vector<8x1xf32>
    %126 = vector.broadcast %125 : vector<8x1xf32> to vector<8x16xf32>
    %127 = arith.mulf %124, %126 : vector<8x16xf32>
    %c0_42 = arith.constant 0 : index
    %c96 = arith.constant 96 : index
    %128 = vector.load %arg8[%c0_42, %c96] : memref<8x128xf32, #tpu.memory_space<vmem>>, vector<8x16xf32>
    tpu.vector_store %arg8[%c0_42, %c96], %127 {strides = array<i32>} : memref<8x128xf32, #tpu.memory_space<vmem>>, vector<8x16xf32>,
    %129 = vector.extract_strided_slice %6 {offsets = [0, 112], sizes = [8, 16], strides = [1, 1]} : vector<8x128xf32> to vector<8x16xf32>
    %130 = vector.extract_strided_slice %7 {offsets = [0, 112], sizes = [8, 16], strides = [1, 1]} : vector<8x128xf32> to vector<8x16xf32>
    %131 = vector.extract_strided_slice %8 {offsets = [0, 112], sizes = [8, 16], strides = [1, 1]} : vector<8x128xf32> to vector<8x16xf32>
    "tpu.trace_start"() <{level = 10 : i32, message = "qd,kd->qk"}> : () -> ()
    %cst_43 = arith.constant dense<0.000000e+00> : vector<8x8xf32>
    %132 = tpu.matmul %129, %130, %cst_43 {dimension_numbers = #tpu.dot_dimension_numbers<[1], [1], [0], [0], [0, 0, 1, 0], [], []>} : vector<8x16xf32>, vector<8x16xf32>, vector<8x8xf32> -> vector<8x8xf32>
    "tpu.trace_stop"() : () -> ()
    %133 = arith.addf %132, %9 : vector<8x8xf32>
    %cst_44 = arith.constant dense<0xFF800000> : vector<8xf32>
    %134 = vector.multi_reduction <maximumf>, %133, %cst_44 [1] : vector<8x8xf32> to vector<8xf32>
    %135 = vector.shape_cast %134 : vector<8xf32> to vector<8x1xf32>
    %136 = vector.broadcast %135 : vector<8x1xf32> to vector<8x8xf32>
    %137 = arith.subf %133, %136 : vector<8x8xf32>
    %138 = math.exp %137 : vector<8x8xf32>
    %cst_45 = arith.constant dense<0.000000e+00> : vector<8xf32>
    %139 = vector.multi_reduction <add>, %138, %cst_45 [1] : vector<8x8xf32> to vector<8xf32>
    %140 = vector.shape_cast %139 : vector<8xf32> to vector<8x1xf32>
    %cst_46 = arith.constant dense<0.000000e+00> : vector<8x16xf32>
    %141 = tpu.matmul %138, %131, %cst_46 {dimension_numbers = #tpu.dot_dimension_numbers<[1], [0], [0], [1], [0, 0, 1, 1], [], []>} : vector<8x8xf32>, vector<8x16xf32>, vector<8x16xf32> -> vector<8x16xf32>
    %142 = tpu.reciprocal %140 {approx = true} : vector<8x1xf32> -> vector<8x1xf32>
    %143 = vector.broadcast %142 : vector<8x1xf32> to vector<8x16xf32>
    %144 = arith.mulf %141, %143 : vector<8x16xf32>
    %c0_47 = arith.constant 0 : index
    %c112 = arith.constant 112 : index
    %145 = vector.load %arg8[%c0_47, %c112] : memref<8x128xf32, #tpu.memory_space<vmem>>, vector<8x16xf32>
    tpu.vector_store %arg8[%c0_47, %c112], %144 {strides = array<i32>} : memref<8x128xf32, #tpu.memory_space<vmem>>, vector<8x16xf32>,
    %c0_48 = arith.constant 0 : index
    %c0_49 = arith.constant 0 : index
    %146 = vector.load %arg8[%c0_48, %c0_49] : memref<8x128xf32, #tpu.memory_space<vmem>>, vector<8x128xf32>
    %c0_50 = arith.constant 0 : index
    %c0_51 = arith.constant 0 : index
    %147 = vector.load %arg5[%c0_50, %c0_51] : memref<128x16xf32, #tpu.memory_space<vmem>>, vector<128x16xf32>
    %cst_52 = arith.constant dense<0.000000e+00> : vector<8x16xf32>
    %148 = tpu.matmul %146, %147, %cst_52 {dimension_numbers = #tpu.dot_dimension_numbers<[1], [0], [0], [1], [0, 0, 1, 1], [], []>} : vector<8x128xf32>, vector<128x16xf32>, vector<8x16xf32> -> vector<8x16xf32>
    %c0_53 = arith.constant 0 : index
    %c0_54 = arith.constant 0 : index
    %149 = vector.load %arg6[%c0_53, %c0_54] : memref<1x16xf32, #tpu.memory_space<vmem>>, vector<1x16xf32>
    %150 = vector.broadcast %149 : vector<1x16xf32> to vector<8x16xf32>
    %151 = arith.addf %148, %150 : vector<8x16xf32>
    %c0_55 = arith.constant 0 : index
    %c0_56 = arith.constant 0 : index
    %152 = vector.load %arg7[%c0_55, %c0_56] : memref<8x16xf32, #tpu.memory_space<vmem>>, vector<8x16xf32>
    tpu.vector_store %arg7[%c0_55, %c0_56], %151 {strides = array<i32>} : memref<8x16xf32, #tpu.memory_space<vmem>>, vector<8x16xf32>,
    return
  }
  func.func @transform_0(%arg0: i32) -> (i32, i32) {
    %c0_i32 = arith.constant 0 : i32
    %c0_i32_0 = arith.constant 0 : i32
    return %arg0, %c0_i32 : i32, i32
  }
  func.func @transform_1(%arg0: i32) -> (i32, i32) {
    %c0_i32 = arith.constant 0 : i32
    %c0_i32_0 = arith.constant 0 : i32
    %c0_i32_1 = arith.constant 0 : i32
    return %c0_i32, %c0_i32_0 : i32, i32
  }
  func.func @transform_2(%arg0: i32) -> (i32, i32) {
    %c0_i32 = arith.constant 0 : i32
    %c0_i32_0 = arith.constant 0 : i32
    %c0_i32_1 = arith.constant 0 : i32
    return %c0_i32, %c0_i32_0 : i32, i32
  }
  func.func @transform_3(%arg0: i32) -> (i32, i32) {
    %c0_i32 = arith.constant 0 : i32
    %c0_i32_0 = arith.constant 0 : i32
    %c0_i32_1 = arith.constant 0 : i32
    return %c0_i32, %c0_i32_0 : i32, i32
  }
  func.func @transform_4(%arg0: i32) -> (i32, i32) {
    %c0_i32 = arith.constant 0 : i32
    %c0_i32_0 = arith.constant 0 : i32
    %c0_i32_1 = arith.constant 0 : i32
    return %c0_i32, %c0_i32_0 : i32, i32
  }
  func.func @transform_5(%arg0: i32) -> (i32, i32) {
    %c0_i32 = arith.constant 0 : i32
    %c0_i32_0 = arith.constant 0 : i32
    %c0_i32_1 = arith.constant 0 : i32
    return %c0_i32, %c0_i32_0 : i32, i32
  }
  func.func @transform_6(%arg0: i32) -> (i32, i32) {
    %c0_i32 = arith.constant 0 : i32
    %c0_i32_0 = arith.constant 0 : i32
    return %arg0, %c0_i32 : i32, i32
  }
}

</mosaic_0001>

<bundles_post_ra>
// kernel: tpu_custom_call.1
= control target key start
LH: loop header
LB: loop body
LE: loop exit
PB: predicated region body
PF: predicated region fallthrough
CT: control target
= control target key end

     0   :  { %11 = vsyncpa [#allocation4], 0  ;;  %s1495_s0 = inlined_call_operand.vmem [shape: f32[16,32], index: 0, kind: input, shape index: {}]   ;;  %s1496_s1 = inlined_call_operand.vmem [shape: f32[8,8], index: 1, kind: input, shape index: {}]   ;;  %s1497_s2 = inlined_call_operand.vmem [shape: f32[32,384], index: 2, kind: input, shape index: {}]   ;;  %s1498_s3 = inlined_call_operand.vmem [shape: f32[1,384], index: 3, kind: input, shape index: {}]   ;;  %s1499_s4 = inlined_call_operand.vmem [shape: f32[128,16], index: 4, kind: input, shape index: {}]   ;;  %s1500_s5 = inlined_call_operand.vmem [shape: f32[1,16], index: 5, kind: input, shape index: {}]   ;;  %s1501_s6 = inlined_call_operand.hbm [shape: f32[16,16], index: 6, kind: output, shape index: {}]  }
   0x1   :  { %13 = vsyncpa [#allocation4 + $0x1], 0  ;;  %s1233_s21 = smov 0   ;;  %s1235_s22 = smov 0  }
   0x2   :  { %s1237_s23 = smov 0   ;;  %s1239_s24 = smov 0  }
   0x3 LB: > { %s1254_s25 = sadd.s32 4294967295, %s1189_s24   ;;  %s1011_s26 = sadd.s32 4294967294, %s1189_s24   ;;  %s1189_s24 = sphi %s1239_s24, %s1507_s24   ;;  %s1185_s23 = sphi %s1237_s23, %s1506_s23   ;;  %s1181_s22 = sphi %s1235_s22, %s1505_s22   ;;  %s1177_s21 = sphi %s1233_s21, %s1504_s21  }
   0x4   : > { %s1258_s27 = sadd.s32 1, %s1189_s24   ;;  %s157_s28 = sadd.s32 1, %s1185_s23 }
   0x5   : > { %s154_s29 = ssub.s32 %s1189_s24, %s1258_s27  ;;  %p167_p0 = scmp.ne.s32.totalorder %s1185_s23, %s1181_s22 }
   0x6   : > { %p155_p1 = scmp.eq.s32.totalorder %s154_s29, 0  ;;  %p168_p2 = scmp.eq.s32.totalorder %s1254_s25, 1 }
   0x7   : > { %p173_p3 = scmp.ne.s32.totalorder %s1181_s22, %s1177_s21  ;;  %p174_p4 = scmp.eq.s32.totalorder %s1011_s26, 1 }
   0x8   : > { %s1269_s30 = scalar_select %p155_p1, %s1185_s23, %s157_s28  }
   0x9   : > { %p1271_p5 = por %p168_p2, %p167_p0  ;;  %p1275_p6 = por %p174_p4, %p173_p3 }
   0xa   : > { %p1014_p7 = scmp.ge.s32.totalorder %s1189_s24, 1  ;;  %p214_p8 = scmp.lt.s32.totalorder %s1189_s24, 3 }
   0xc   : > { %p215_p9 = pnand %p1014_p7, %p214_p8 }
   0xd   : > { %p243_p10 = scmp.lt.s32.totalorder (!%p215_p9), %s1254_s25, 1  ;;  %s1191_s10 = smov (!%p215_p9), 64  }
   0xe   : > { %218 = sbr.rel (%p215_p9) target bundleno = 974 (0x3ce), region = 44  ;;  %s1192_s11 = smov (!%p215_p9), 96  }
   0xf   : > { %s1193_s12 = smov (!%p215_p9), 112   ;;  %s1195_s14 = smov (!%p215_p9), 80  }
  0x10   : > { %s1196_s15 = smov (!%p215_p9), 48   ;;  %s1197_s16 = smov (!%p215_p9), 16  }
  0x11   : > { %s1045_s29 = sshll.u32 (!%p215_p9), %s1254_s25, 3 }
  0x13   : > { %v258_v0 = vld [vmem:[%s1497_s2 + $0x50] sm:$0xff]  ;;  %v255_v1 = vld [vmem:[%s1497_s2 + $0x38] sm:$0xff]  ;;  %v257_v2 = vld [vmem:[%s1497_s2 + $0x48] sm:$0xff]  ;;  %s244_s26 = scalar_select %p243_p10, %s1254_s25, 1  ;;  %vm268_vm0 = vcmask 261120   ;;  %vm333_vm1 = vcmask 130048  }
  0x14   : > { %304 = vmatpush.msra.mxu1 %v258_v0  ;;  %284 = vmatpush.msra.mxu0 %v257_v2  ;;  %v254_v3 = vld [vmem:[%s1497_s2 + $0x30] sm:$0xff]  ;;  %v252_v4 = vld [vmem:[%s1497_s2 + $0x20] sm:$0xff]  ;;  %v251_v5 = vld [vmem:[%s1497_s2 + $0x18] sm:$0xff]  ;;  %vm360_vm2 = vcmask 64512   ;;  %vm466_vm3 = vcmask 261248   ;;  %vm537_vm4 = vcmask 392448  }
  0x15   : > { %v259_v6 = vld [vmem:[%s1497_s2 + $0x58] sm:$0xff]  ;;  %v256_v7 = vld [vmem:[%s1497_s2 + $0x40] sm:$0xff]  ;;  %v249_v8 = vld [vmem:[%s1497_s2 + $0x8] sm:$0xff]  ;;  %s1016_s13 = sshll.u32 %s244_s26, 3  ;;  %vm608_vm5 = vcmask 523648   ;;  %vm679_vm6 = vcmask 654848  }
  0x16   : > { %305 = vmatpush.msra.mxu1 %v255_v1  ;;  %285 = vmatpush.msra.mxu0 %v254_v3  ;;  %v248_v9 = vld [vmem:[%s1497_s2] sm:$0xff]  ;;  %s246_s18 = scalar_lea.vmem %s1495_s0, %s1016_s13  ;;  %v253_v11 = vld [vmem:[%s1497_s2 + $0x28] sm:$0xff]  ;;  %v250_v12 = vld [vmem:[%s1497_s2 + $0x10] sm:$0xff]  ;;  %s1194_s13 = smov 32   ;;  %vm750_vm7 = vcmask 786048   ;;  %vm821_vm8 = vcmask 917248  }
  0x17   : > { %324 = vmatpush.msra.mxu3 %v259_v6  ;;  %v247_v10 = vld [vmem:[%s246_s18] sm:$0xff]  ;;  %vm892_vm9 = vcmask 1048448   ;;  %s240_s26 = sand.u32 1, %s1181_s22  }
  0x18   : > { %306 = vmatpush.msra.mxu1 %v252_v4  ;;  %286 = vmatpush.msra.mxu0 %v251_v5  ;;  %v260_v13 = vld [vmem:[%s1498_s3] sm:$0x7]  ;;  %s1015_s28 = sshll.u32 %s240_s26, 3  ;;  %s937_s17 = scalar_lea.sflag [#allocation4], %s240_s26 }
  0x19   : > { %325 = vmatpush.msra.mxu3 %v256_v7  ;;  %v263_v14 = vperm.slane %v260_v13, 1  ;;  %v262_v15 = vperm.slane %v260_v13, 0  ;;  %v264_v21 = vperm.slane %v260_v13, 2  ;;  %v332_v32 = vld [vmem:[%s1496_s1] sm:$0xff] }
  0x1a   : > { %307 = vmatpush.msra.mxu1 %v249_v8  ;;  %287 = vmatpush.msra.mxu0 %v248_v9 }
  0x1b   : > { %1018 = vmatmul.msk.f32.vlgmr.msra.gmra.mxu1 %vm268_vm0, %v247_v10  ;;  %1017 = vmatmul.msk.f32.vlgmr.msra.gmra.mxu0 %vm268_vm0, %v247_v10 }
  0x1c   : > { %326 = vmatpush.msra.mxu3 %v253_v11 }
  0x1e   : > { %327 = vmatpush.msra.mxu3 %v250_v12 }
  0x1f   : > { %1019 = vmatmul.msk.f32.vlgmr.msra.gmra.mxu3 %vm268_vm0, %v247_v10 }
  0x98   : > { %v309_v16 = vpop.f32.mrf.mxu1  ;;  %v289_v17 = vpop.f32.mrf.mxu0 }
  0x99   : > { %v310_v18 = vadd.f32 %v309_v16, %v263_v14  ;;  %v290_v19 = vadd.f32 %v289_v17, %v262_v15 }
  0x9b   : > { %612 = vrot.lane.b32.xlu2 %v310_v18, %s1191_s10  ;;  %470 = vrot.lane.b32.xlu1 %v310_v18, %s1192_s11 }
  0x9c   : > { %398 = vrot.lane.b32.xlu0 %v310_v18, %s1193_s12  ;;  %1020 = vmatpush.xpose.msk.msrb.mxu3 %vm333_vm1, %v310_v18 }
  0x9f   : > { %1021 = vmatmul.msk.f32.vlgmr.msrb.gmra.mxu3 %vm333_vm1, %v290_v19 }
  0xa2   : > { %v329_v22 = vpop.f32.mrf.mxu3 }
  0xa3   : > { %610 = vrot.lane.b32.xlu2 %v290_v19, %s1191_s10  ;;  %468 = vrot.lane.b32.xlu1 %v290_v19, %s1192_s11  ;;  %v1342_v23 = vadd.f32 %v329_v22, %v264_v21 }
  0xa4   : > { %396 = vrot.lane.b32.xlu0 %v290_v19, %s1193_s12 }
  0xa5   : > { %388 = vmatpush.msra.mxu3 %v1342_v23 }
  0xab   : > { %754 = vrot.lane.b32.xlu2 %v310_v18, %s1194_s13  ;;  %539 = vrot.lane.b32.xlu1 %v290_v19, %s1195_s14 }
  0xac   : > { %541 = vrot.lane.b32.xlu0 %v310_v18, %s1195_s14 }
  0xb3   : > { %681 = vrot.lane.b32.xlu2 %v290_v19, %s1196_s15  ;;  %683 = vrot.lane.b32.xlu1 %v310_v18, %s1196_s15 }
  0xb4   : > { %752 = vrot.lane.b32.xlu0 %v290_v19, %s1194_s13 }
  0xbb   : > { %823 = vrot.lane.b32.xlu1 %v290_v19, %s1197_s16 }
  0xbc   : > { %825 = vrot.lane.b32.xlu0 %v310_v18, %s1197_s16 }
  0xc4   : > { %434 = vrot.lane.b32.xlu0 %v1342_v23, %s1193_s12 }
  0xf5   : > { %v613_v20 = vpop.permute.xlu2 %612 }
  0xf6   : > { %1032 = vmatpush.xpose.msk.msra.mxu2 %vm333_vm1, %v613_v20 }
  0xfd   : > { %v611_v24 = vpop.permute.xlu2 %610 }
  0xfe   : > { %1033 = vmatmul.msk.f32.vlgmr.msra.gmra.mxu2 %vm333_vm1, %v611_v24 }
 0x105   : > { %v755_v25 = vpop.permute.xlu2 %754 }
 0x106   : > { %1038 = vmatpush.xpose.msk.msrb.mxu2 %vm333_vm1, %v755_v25 }
 0x10d   : > { %v471_v26 = vpop.permute.xlu1 %470  ;;  %v682_v38 = vpop.permute.xlu2 %681 }
 0x10e   : > { %v399_v27 = vpop.permute.xlu0 %398 }
 0x10f   : > { %1023 = vmatpush.xpose.msk.msrb.mxu0 %vm333_vm1, %v399_v27 }
 0x113   : > { %1026 = vmatpush.xpose.msk.msra.mxu0 %vm333_vm1, %v471_v26 }
 0x115   : > { %v469_v28 = vpop.permute.xlu1 %468 }
 0x116   : > { %v397_v29 = vpop.permute.xlu0 %396 }
 0x117   : > { %1024 = vmatmul.msk.f32.vlgmr.msrb.gmra.mxu0 %vm333_vm1, %v397_v29 }
 0x11d   : > { %v540_v30 = vpop.permute.xlu1 %539 }
 0x11e   : > { %v542_v31 = vpop.permute.xlu0 %541 }
 0x11f   : > { %1027 = vmatmul.msk.f32.vlgmr.msra.gmra.mxu0 %vm333_vm1, %v469_v28 }
 0x120   : > { %1029 = vmatpush.xpose.msk.msrb.mxu0 %vm333_vm1, %v542_v31 }
 0x122   : > { %v357_v33 = vpop.f32.mrf.mxu3 }
 0x123   : > { %v358_v34 = vadd.f32 %v357_v33, %v332_v32 }
 0x125   : > { %v684_v35 = vpop.permute.xlu1 %683  ;;  %v361_v36 = vsel %vm360_vm2, %v358_v34, -inf }
 0x126   : > { %v753_v37 = vpop.permute.xlu0 %752  ;;  %362 = vmax.xlane.f32.xlu2 %v361_v36  ;;  %1035 = vmatpush.xpose.msk.msra.mxu0 %vm333_vm1, %v684_v35 }
 0x127   : > { %1030 = vmatmul.msk.f32.vlgmr.msrb.gmra.mxu0 %vm333_vm1, %v540_v30  ;;  %1039 = vmatmul.msk.f32.vlgmr.msrb.gmra.mxu2 %vm333_vm1, %v753_v37 }
 0x12d   : > { %v824_v40 = vpop.permute.xlu1 %823 }
 0x12e   : > { %v826_v39 = vpop.permute.xlu0 %825 }
 0x12f   : > { %1036 = vmatmul.msk.f32.vlgmr.msra.gmra.mxu0 %vm333_vm1, %v682_v38 }
 0x130   : > { %1041 = vmatpush.xpose.msk.msrb.mxu0 %vm333_vm1, %v826_v39 }
 0x136   : > { %v435_v63 = vpop.permute.xlu0 %434 }
 0x137   : > { %1042 = vmatmul.msk.f32.vlgmr.msrb.gmra.mxu0 %vm333_vm1, %v824_v40  ;;  %455 = vmatpush.msrb.mxu1 %v435_v63 }
 0x181   : > { %v635_v41 = vpop.f32.mrf.mxu2 }
 0x182   : > { %v636_v42 = vadd.f32 %v635_v41, %v332_v32 }
 0x184   : > { %v638_v43 = vsel %vm360_vm2, %v636_v42, -inf }
 0x185   : > { %639 = vmax.xlane.f32.xlu2 %v638_v43 }
 0x194   : > { %v421_v44 = vpop.f32.mrf.mxu0 }
 0x195   : > { %v422_v45 = vadd.f32 %v421_v44, %v332_v32 }
 0x197   : > { %v424_v46 = vsel %vm360_vm2, %v422_v45, -inf }
 0x198   : > { %425 = vmax.xlane.f32.xlu0 %v424_v46 }
 0x199   : > { %v363_v47 = vpop.xlane.xlu2 %362 }
 0x19a   : > { %v364_v48 = vsub.f32 %v358_v34, %v363_v47 }
 0x19c   : > { %v365_v49 = vmul.f32 1.442695, %v364_v48  ;;  %v493_v50 = vpop.f32.mrf.mxu0 }
 0x19d   : > { %v494_v51 = vadd.f32 %v493_v50, %v332_v32 }
 0x19e   : > { %1095 = vpow2.f32 %v365_v49 }
 0x19f   : > { %v496_v52 = vsel %vm360_vm2, %v494_v51, -inf }
 0x1a0   : > { %497 = vmax.xlane.f32.xlu1 %v496_v52 }
 0x1a4   : > { %v1096_v53 = vpop.eup %1095  ;;  %v564_v56 = vpop.f32.mrf.mxu0 }
 0x1a5   : > { %1022 = vmatmul.msk.f32.vlgmr.msra.gmra.mxu3 %vm360_vm2, %v1096_v53  ;;  %v565_v58 = vadd.f32 %v564_v56, %v332_v32 }
 0x1a7   : > { %v567_v59 = vsel %vm360_vm2, %v565_v58, -inf }
 0x1aa   : > { %v777_v54 = vpop.f32.mrf.mxu2 }
 0x1ab   : > { %v778_v55 = vadd.f32 %v777_v54, %v332_v32 }
 0x1ac   : > { %576 = vrot.lane.b32.xlu0 %v1342_v23, %s1195_s14  ;;  %v706_v60 = vpop.f32.mrf.mxu0 }
 0x1ad   : > { %v780_v57 = vsel %vm360_vm2, %v778_v55, -inf  ;;  %v707_v61 = vadd.f32 %v706_v60, %v332_v32 }
 0x1ae   : > { %781 = vmax.xlane.f32.xlu2 %v780_v57 }
 0x1af   : > { %v709_v62 = vsel %vm360_vm2, %v707_v61, -inf }
 0x1b4   : > { %718 = vrot.lane.b32.xlu0 %v1342_v23, %s1196_s15  ;;  %v848_v0 = vpop.f32.mrf.mxu0 }
 0x1b5   : > { %v1383_v1 = vadd.f32 %v848_v0, %v332_v32 }
 0x1b6   : > { %568 = vmax.xlane.f32.xlu2 %v567_v59 }
 0x1b7   : > { %v851_v2 = vsel %vm360_vm2, %v1383_v1, -inf }
 0x1b9   : > { %505 = vrot.lane.b32.xlu1 %v1342_v23, %s1192_s11 }
 0x1bc   : > { %789 = vrot.lane.b32.xlu0 %v1342_v23, %s1194_s13 }
 0x1be   : > { %710 = vmax.xlane.f32.xlu2 %v709_v62 }
 0x1c4   : > { %860 = vrot.lane.b32.xlu0 %v1342_v23, %s1197_s16 }
 0x1d6   : > { %647 = vrot.lane.b32.xlu2 %v1342_v23, %s1191_s10  ;;  %v367_v23 = vsel %vm360_vm2, %v1096_v53, 0.0 }
 0x1e3   : > { %852 = vmax.xlane.f32.xlu1 %v851_v2 }
 0x1f8   : > { %v640_v3 = vpop.xlane.xlu2 %639 }
 0x1f9   : > { %v641_v4 = vsub.f32 %v636_v42, %v640_v3 }
 0x1fb   : > { %v642_v5 = vmul.f32 1.442695, %v641_v4 }
 0x1fd   : > { %1097 = vpow2.f32 %v642_v5 }
 0x203   : > { %v1098_v6 = vpop.eup %1097 }
 0x204   : > { %v644_v7 = vsel %vm360_vm2, %v1098_v6, 0.0 }
 0x205   : > { %645 = vadd.xlane.f32.xlu1 %v644_v7 }
 0x20b   : > { %v426_v8 = vpop.xlane.xlu0 %425 }
 0x20c   : > { %v427_v9 = vsub.f32 %v422_v45, %v426_v8 }
 0x20e   : > { %v428_v10 = vmul.f32 1.442695, %v427_v9 }
 0x210   : > { %1099 = vpow2.f32 %v428_v10 }
 0x213   : > { %v498_v11 = vpop.xlane.xlu1 %497 }
 0x214   : > { %v499_v12 = vsub.f32 %v494_v51, %v498_v11 }
 0x216   : > { %v1100_v13 = vpop.eup %1099  ;;  %v500_v14 = vmul.f32 1.442695, %v499_v12 }
 0x217   : > { %1025 = vmatmul.msk.f32.vlgmr.msrb.gmra.mxu1 %vm360_vm2, %v1100_v13  ;;  %v430_v15 = vsel %vm360_vm2, %v1100_v13, 0.0 }
 0x218   : > { %1101 = vpow2.f32 %v500_v14  ;;  %431 = vadd.xlane.f32.xlu2 %v430_v15  ;;  %v910_v14 = vld [vmem:[%s1499_s4 + $0x78] sm:$0xff]  ;;  %v909_v15 = vld [vmem:[%s1499_s4 + $0x70] sm:$0xff] }
 0x219   : > { %915 = vmatpush.msra.mxu2 %v910_v14 }
 0x21b   : > { %916 = vmatpush.msra.mxu2 %v909_v15 }
 0x21e   : > { %v1102_v16 = vpop.eup %1101  ;;  %v577_v17 = vpop.permute.xlu0 %576 }
 0x21f   : > { %597 = vmatpush.msra.mxu1 %v577_v17  ;;  %v502_v18 = vsel %vm360_vm2, %v1102_v16, 0.0  ;;  %v907_v17 = vld [vmem:[%s1499_s4 + $0x60] sm:$0xff] }
 0x220   : > { %503 = vadd.xlane.f32.xlu0 %v502_v18  ;;  %v906_v18 = vld [vmem:[%s1499_s4 + $0x58] sm:$0xff] }
 0x221   : > { %v782_v19 = vpop.xlane.xlu2 %781 }
 0x222   : > { %v783_v20 = vsub.f32 %v778_v55, %v782_v19  ;;  %v905_v19 = vld [vmem:[%s1499_s4 + $0x50] sm:$0xff] }
 0x224   : > { %v784_v21 = vmul.f32 1.442695, %v783_v20  ;;  %v904_v20 = vld [vmem:[%s1499_s4 + $0x48] sm:$0xff] }
 0x226   : > { %1103 = vpow2.f32 %v784_v21  ;;  %v719_v22 = vpop.permute.xlu0 %718  ;;  %v903_v21 = vld [vmem:[%s1499_s4 + $0x40] sm:$0xff] }
 0x227   : > { %739 = vmatpush.msrb.mxu1 %v719_v22  ;;  %v902_v22 = vld [vmem:[%s1499_s4 + $0x38] sm:$0xff] }
 0x228   : > { %368 = vadd.xlane.f32.xlu0 %v367_v23  ;;  %v390_v53 = vpop.f32.mrf.mxu3  ;;  %v901_v23 = vld [vmem:[%s1499_s4 + $0x30] sm:$0xff] }
 0x229   : > { %v569_v24 = vpop.xlane.xlu2 %568 }
 0x22a   : > { %v570_v25 = vsub.f32 %v565_v58, %v569_v24  ;;  %v900_v24 = vld [vmem:[%s1499_s4 + $0x28] sm:$0xff] }
 0x22b   : > { %v506_v26 = vpop.permute.xlu1 %505 }
 0x22c   : > { %v1104_v27 = vpop.eup %1103  ;;  %v571_v28 = vmul.f32 1.442695, %v570_v25  ;;  %526 = vmatpush.msrb.mxu3 %v506_v26  ;;  %v899_v25 = vld [vmem:[%s1499_s4 + $0x20] sm:$0xff]  ;;  %v898_v26 = vld [vmem:[%s1499_s4 + $0x18] sm:$0xff] }
 0x22d   : > { %1028 = vmatmul.msk.f32.vlgmr.msrb.gmra.mxu3 %vm360_vm2, %v1102_v16  ;;  %v786_v29 = vsel %vm360_vm2, %v1104_v27, 0.0  ;;  %v908_v16 = vld [vmem:[%s1499_s4 + $0x68] sm:$0xff] }
 0x22e   : > { %1105 = vpow2.f32 %v571_v28  ;;  %v790_v30 = vpop.permute.xlu0 %789  ;;  %787 = vadd.xlane.f32.xlu2 %v786_v29  ;;  %917 = vmatpush.msra.mxu2 %v908_v16  ;;  %v896_v28 = vld [vmem:[%s1499_s4 + $0x8] sm:$0xff]  ;;  %v895_v29 = vld [vmem:[%s1499_s4] sm:$0xff] }
 0x230   : > { %918 = vmatpush.msra.mxu2 %v907_v17 }
 0x231   : > { %v711_v31 = vpop.xlane.xlu2 %710 }
 0x232   : > { %v712_v32 = vsub.f32 %v707_v61, %v711_v31  ;;  %919 = vmatpush.msra.mxu2 %v906_v18 }
 0x234   : > { %v1106_v33 = vpop.eup %1105  ;;  %v713_v34 = vmul.f32 1.442695, %v712_v32  ;;  %920 = vmatpush.msra.mxu2 %v905_v19 }
 0x235   : > { %1031 = vmatmul.msk.f32.vlgmr.msra.gmra.mxu1 %vm360_vm2, %v1106_v33  ;;  %v573_v35 = vsel %vm360_vm2, %v1106_v33, 0.0 }
 0x236   : > { %1107 = vpow2.f32 %v713_v34  ;;  %v861_v36 = vpop.permute.xlu0 %860  ;;  %574 = vadd.xlane.f32.xlu1 %v573_v35  ;;  %921 = vmatpush.msra.mxu2 %v904_v20 }
 0x237   : > { %881 = vmatpush.msra.mxu1 %v861_v36 }
 0x238   : > { %922 = vmatpush.msra.mxu2 %v903_v21 }
 0x239   : > { %v648_v37 = vpop.permute.xlu2 %647 }
 0x23a   : > { %668 = vmatpush.msra.mxu3 %v648_v37  ;;  %923 = vmatpush.msra.mxu2 %v902_v22  ;;  %v1094_v37 = vld [vmem:[%s1500_s5] ss:$0 sm:$0xff] }
 0x23b   : > { %1034 = vmatmul.msk.f32.vlgmr.msra.gmra.mxu3 %vm360_vm2, %v1098_v6 }
 0x23c   : > { %v1108_v38 = vpop.eup %1107  ;;  %810 = vmatpush.msrb.mxu3 %v790_v30  ;;  %924 = vmatpush.msra.mxu2 %v901_v23 }
 0x23d   : > { %1037 = vmatmul.msk.f32.vlgmr.msrb.gmra.mxu1 %vm360_vm2, %v1108_v38  ;;  %v715_v39 = vsel %vm360_vm2, %v1108_v38, 0.0 }
 0x23e   : > { %716 = vadd.xlane.f32.xlu1 %v715_v39  ;;  %925 = vmatpush.msra.mxu2 %v900_v24 }
 0x240   : > { %926 = vmatpush.msra.mxu2 %v899_v25 }
 0x242   : > { %927 = vmatpush.msra.mxu2 %v898_v26 }
 0x243   : > { %1040 = vmatmul.msk.f32.vlgmr.msrb.gmra.mxu3 %vm360_vm2, %v1104_v27  ;;  %v897_v27 = vld [vmem:[%s1499_s4 + $0x10] sm:$0xff] }
 0x244   : > { %928 = vmatpush.msra.mxu2 %v897_v27 }
 0x246   : > { %929 = vmatpush.msra.mxu2 %v896_v28 }
 0x248   : > { %930 = vmatpush.msra.mxu2 %v895_v29 }
 0x256   : > { %v853_v40 = vpop.xlane.xlu1 %852 }
 0x257   : > { %v854_v41 = vsub.f32 %v1383_v1, %v853_v40 }
 0x259   : > { %v855_v42 = vmul.f32 1.442695, %v854_v41 }
 0x25b   : > { %1109 = vpow2.f32 %v855_v42 }
 0x261   : > { %v1110_v43 = vpop.eup %1109 }
 0x262   : > { %1043 = vmatmul.msk.f32.vlgmr.msra.gmra.mxu1 %vm360_vm2, %v1110_v43  ;;  %v857_v44 = vsel %vm360_vm2, %v1110_v43, 0.0 }
 0x263   : > { %858 = vadd.xlane.f32.xlu1 %v857_v44 }
 0x278   : > { %v646_v51 = vpop.xlane.xlu1 %645 }
 0x28b   : > { %v432_v45 = vpop.xlane.xlu2 %431 }
 0x28c   : > { %1111 = vrcp.f32 %v432_v45 }
 0x292   : > { %v1112_v47 = vpop.eup %1111 }
 0x293   : > { %v504_v46 = vpop.xlane.xlu0 %503 }
 0x294   : > { %v457_v48 = vpop.f32.mrf.mxu1 }
 0x295   : > { %v461_v49 = vmul.f32 %v1112_v47, %v457_v48 }
 0x297   : > { %463 = vrot.lane.b32.xlu2 %v461_v49, %s1197_s16 }
 0x29b   : > { %v369_v50 = vpop.xlane.xlu0 %368 }
 0x29c   : > { %1113 = vrcp.f32 %v369_v50 }
 0x29d   : > { %1115 = vrcp.f32 %v504_v46 }
 0x2a1   : > { %v788_v2 = vpop.xlane.xlu2 %787 }
 0x2a2   : > { %v1114_v52 = vpop.eup %1113 }
 0x2a3   : > { %v394_v54 = vmul.f32 %v1114_v52, %v390_v53  ;;  %v1116_v56 = vpop.eup %1115 }
 0x2a5   : > { %395 = vst.msk [vmem:[#allocation2] sm:$0xff] %vm333_vm1, %v394_v54 }
 0x2a9   : > { %v575_v55 = vpop.xlane.xlu1 %574 }
 0x2aa   : > { %1117 = vrcp.f32 %v575_v55 }
 0x2b0   : > { %v528_v57 = vpop.f32.mrf.mxu3  ;;  %v1118_v60 = vpop.eup %1117 }
 0x2b1   : > { %v532_v58 = vmul.f32 %v1116_v56, %v528_v57  ;;  %v717_v59 = vpop.xlane.xlu1 %716 }
 0x2b2   : > { %v599_v61 = vpop.f32.mrf.mxu1  ;;  %1119 = vrcp.f32 %v717_v59 }
 0x2b3   : > { %v603_v62 = vmul.f32 %v1118_v60, %v599_v61  ;;  %534 = vrot.lane.b32.xlu1 %v532_v58, %s1194_s13  ;;  %1121 = vrcp.f32 %v646_v51 }
 0x2b4   : > { %1123 = vrcp.f32 %v788_v2 }
 0x2b5   : > { %605 = vrot.lane.b32.xlu0 %v603_v62, %s1196_s15 }
 0x2b8   : > { %v1120_v63 = vpop.eup %1119 }
 0x2b9   : > { %v1122_v3 = vpop.eup %1121 }
 0x2ba   : > { %v741_v0 = vpop.f32.mrf.mxu1  ;;  %v1124_v6 = vpop.eup %1123 }
 0x2bb   : > { %v745_v1 = vmul.f32 %v1120_v63, %v741_v0 }
 0x2bd   : > { %747 = vrot.lane.b32.xlu0 %v745_v1, %s1195_s14  ;;  %s242_s14 = scalar_lea.vmem [#allocation3], %s1015_s28  ;;  %s1147_s28 = scalar_lea.hbm %s1501_s6, 16 }
 0x2be   : > { %v670_v4 = vpop.f32.mrf.mxu3  ;;  %s949_s15 = sshll.u32 %s242_s14, 4  ;;  %s950_s15 = int_to_ptr.vmem [resolvable:$true] %s949_s15 }
 0x2bf   : > { %v674_v5 = vmul.f32 %v1122_v3, %v670_v4 }
 0x2c1   : > { %676 = vrot.lane.b32.xlu2 %v674_v5, %s1191_s10 }
 0x2c6   : > { %v812_v7 = vpop.f32.mrf.mxu3 }
 0x2c7   : > { %v816_v8 = vmul.f32 %v1124_v6, %v812_v7 }
 0x2c9   : > { %818 = vrot.lane.b32.xlu1 %v816_v8, %s1192_s11  ;;  %s947_s11 = scalar_lea.hbm %s1501_s6, %s1045_s29 }
 0x2ca   : > { %s951_s16 = sshll.u32 %s947_s11, 4  ;;  %s952_s16 = int_to_ptr.hbm [resolvable:$true] %s951_s16 }
 0x2cb   : > { %s1141_s25 = sshra.s32 %s952_s16, 4  ;;  %s1142_s25 = int_to_ptr.hbm [resolvable:$true] %s1141_s25 }
 0x2cc   : > { %s1143_s18 = scalar_lea.hbm %s1142_s25, 8  ;;  %p1148_p0 = scmp.lt.s32.totalorder %s1142_s25, %s1501_s6 }
 0x2cd   : > { %p1144_p11 = scmp.ne.s32.totalorder %s1142_s25, %s1143_s18  ;;  %p1149_p1 = scmp.lt.s32.totalorder %s1147_s28, %s1143_s18 }
 0x2cf   : > { %p1145_p12 = pnand %p1144_p11, %p1271_p5  ;;  %p1150_p2 = por %p1149_p1, %p1148_p0 }
 0x2d1   : > { %p1146_p13 = pneg %p1145_p12 }
 0x2d3   : > { %p1151_p3 = pnand %p1150_p2, %p1146_p13 }
 0x2d6   : > { %v859_v9 = vpop.xlane.xlu1 %858 }
 0x2d7   : > { %1125 = vrcp.f32 %v859_v9 }
 0x2dd   : > { %v1126_v10 = vpop.eup %1125 }
 0x2df   : > { %v883_v11 = vpop.f32.mrf.mxu1 }
 0x2e0   : > { %v887_v12 = vmul.f32 %v1126_v10, %v883_v11 }
 0x2e2   : > { %889 = vrot.lane.b32.xlu2 %v887_v12, %s1193_s12 }
 0x2f1   : > { %v464_v13 = vpop.permute.xlu2 %463 }
 0x2f2   : > { %467 = vst.msk [vmem:[#allocation2] sm:$0xff] %vm466_vm3, %v464_v13 }
 0x31b   : > { %v677_v32 = vpop.permute.xlu2 %676 }
 0x325   : > { %v535_v30 = vpop.permute.xlu1 %534 }
 0x326   : > { %538 = vst.msk [vmem:[#allocation2] sm:$0xff] %vm537_vm4, %v535_v30 }
 0x327   : > { %v606_v31 = vpop.permute.xlu0 %605 }
 0x328   : > { %609 = vst.msk [vmem:[#allocation2] sm:$0xff] %vm608_vm5, %v606_v31 }
 0x329   : > { %680 = vst.msk [vmem:[#allocation2] sm:$0xff] %vm679_vm6, %v677_v32 }
 0x32f   : > { %v748_v33 = vpop.permute.xlu0 %747 }
 0x330   : > { %751 = vst.msk [vmem:[#allocation2] sm:$0xff] %vm750_vm7, %v748_v33 }
 0x33b   : > { %v819_v34 = vpop.permute.xlu1 %818 }
 0x33c   : > { %822 = vst.msk [vmem:[#allocation2] sm:$0xff] %vm821_vm8, %v819_v34  ;;  %v890_v35 = vpop.permute.xlu2 %889 }
 0x33d   : > { %893 = vst.msk [vmem:[#allocation2] sm:$0xff] %vm892_vm9, %v890_v35 }
 0x344   : > { %v894_v36 = vld [vmem:[#allocation2] sm:$0xff] }
 0x345   : > { %931 = vmatmul.f32.vlgmr.msra.gmra.mxu2 %v894_v36 }
 0x3c8   : > { %v932_v38 = vpop.f32.mrf.mxu2 }
 0x3c9   : > { %v933_v39 = vadd.f32 %v1094_v37, %v932_v38 }
 0x3cb   : > { %935 = vst.msk [vmem:[%s242_s14] sm:$0xff] %vm333_vm1, %v933_v39 }
 0x3cc   : > { %1154 = shalt.err (!%p1151_p3)
}
 0x3cd   : > { %1048 = dma.vmem_to_hbm [thread:$0]  (%p1271_p5), %s950_s15, 128, %s952_s16, %s937_s17  }
 0x3ce PF: > { %p1054_p4 = scmp.ge.s32.totalorder %s1189_s24, 2  ;;  %s963_s26 = sand.u32 1, %s1177_s21  }
 0x3cf   : > { %s964_s10 = scalar_lea.sflag [#allocation4], %s963_s26 }
 0x3d0   : > { %p1051_p7 = pnand %p1054_p4, %p1275_p6 }
 0x3d2   : > { %p1052_p8 = pneg %p1051_p7 }
 0x3d4   : > { %1172 = dma.done.wait (%p1052_p8), %s964_s10, 128  }
 0x3d5   : > { %1174 = vsyncadd (%p1052_p8), %s964_s10, 4294967168  ;;  %p16_p9 = scmp.ge.s32.totalorder %s1258_s27, 4   ;;  %s1504_s21 = smov %s1181_s22 }
 0x3d6   : > { %s1505_s22 = smov %s1185_s23  ;;  %s1506_s23 = smov %s1269_s30 }
 0x3d7   : > { %s1507_s24 = smov %s1258_s27  ;;  %18 = sbr.rel (!%p16_p9) target bundleno = 3 (0x3), region = 79 }
 0x3dc   :  { %970 = vsyncpa [#allocation4], 1 }
 0x3dd   :  { %972 = vsyncpa [#allocation4 + $0x1], 1 }

</bundles_post_ra>
